<compile_context>
chip_gen: v7x
topology: tpu7x:2x2x1
jax: 0.10.0
libtpu: 0.0.40
codegen_flags: <defaults>
</compile_context>

<pallas_src>
import functools

import jax
import jax.numpy as jnp
from jax.experimental import pallas as pl
from jax.experimental.pallas import tpu as pltpu

SLAB = 128  # fused output lane width (digest + action must fit)


def _round_up(x, m):
    return (x + m - 1) // m * m


# --------------------------------------------------------------------------- #
# Kernel
# --------------------------------------------------------------------------- #
def _actor_kernel(x_ref,
                  w1_ref, b1_ref,
                  w2_ref, b2_ref,
                  w3_ref, b3_ref,
                  w4_ref, b4_ref,
                  out_ref,
                  *, action_discrete, action_min, action_max,
                  digest_dim, action_dim):
    cd = w1_ref.dtype  # matmul compute dtype (bf16); accumulation is f32.

    # ---- State submodule: h1 = relu(x @ W1 + b1) (x already bf16, K = 2S) ----
    h1 = jnp.dot(x_ref[...], w1_ref[...], preferred_element_type=jnp.float32)
    h1 = jnp.maximum(h1 + b1_ref[...], 0.0)                    # [TB, H1P]

    # digest lives in lanes [0, D) of a zero-padded 128-lane slab.
    dg = jnp.dot(h1.astype(cd), w2_ref[...], preferred_element_type=jnp.float32)
    dg = jnp.maximum(dg + b2_ref[...], 0.0)                    # [TB, 128]

    # ---- Actor head ----
    h3 = jnp.dot(dg.astype(cd), w3_ref[...], preferred_element_type=jnp.float32)
    h3 = jnp.maximum(h3 + b3_ref[...], 0.0)                    # [TB, H3P]
    # W4/b4 columns were placed at lanes [D, D+A) at prepare time.
    logits = jnp.dot(h3.astype(cd), w4_ref[...], preferred_element_type=jnp.float32)
    logits = logits + b4_ref[...]                              # [TB, 128]

    lane = jax.lax.broadcasted_iota(jnp.int32, logits.shape, 1)
    if action_discrete == 0:
        act = (1.0 + jnp.tanh(logits)) / 2.0 * (action_max - action_min) + action_min
    else:
        # Softmax only over the real action lanes [D, D+A).
        in_act = (lane >= digest_dim) & (lane < digest_dim + action_dim)
        ml = jnp.where(in_act, logits, jnp.full_like(logits, -1e30))
        m = jnp.max(ml, axis=1, keepdims=True)
        e = jnp.exp(ml - m)
        act = e / jnp.sum(e, axis=1, keepdims=True)   # exact: probs sum to 1

    # Fused lane-dense store: digest in [0, D), action in [D, D+A).
    out_ref[...] = jnp.where(lane < digest_dim, dg, act).astype(out_ref.dtype)


# --------------------------------------------------------------------------- #
# Parameter prep (pad H1 / H3 to 128 multiples, fuse output layout, bf16 dots)
# --------------------------------------------------------------------------- #
def prepare_params(params, *, compute_dtype=jnp.bfloat16):
    w1, b1, w2, b2, w3, b3, w4, b4 = params
    S2, H1 = w1.shape                      # [2S, 8S]
    D, H3, A = w2.shape[1], w3.shape[1], w4.shape[1]
    assert D + A <= SLAB, "fused output requires digest_dim + action_dim <= 128"
    H1P, H3P = _round_up(H1, 128), _round_up(H3, 128)

    def pad2(x, rows, cols):
        return jnp.pad(x, ((0, rows - x.shape[0]), (0, cols - x.shape[1])))

    # W4 / b4 real columns placed at lanes [D, D+A) of the 128-wide slab.
    w4_slab = jnp.zeros((H3, SLAB), w4.dtype).at[:, D:D + A].set(w4)
    b4_slab = jnp.zeros((1, SLAB), b4.dtype).at[:, D:D + A].set(b4.reshape(1, A))

    kparams = (
        pad2(w1, S2, H1P).astype(compute_dtype),                 # [2S, H1P]
        pad2(b1.reshape(1, H1), 1, H1P).astype(jnp.float32),     # [1, H1P]
        pad2(w2, H1P, SLAB).astype(compute_dtype),               # [H1P, 128]
        pad2(b2.reshape(1, D), 1, SLAB).astype(jnp.float32),     # [1, 128]
        pad2(w3, SLAB, H3P).astype(compute_dtype),               # [128, H3P]
        pad2(b3.reshape(1, H3), 1, H3P).astype(jnp.float32),     # [1, H3P]
        pad2(w4_slab, H3P, SLAB).astype(compute_dtype),          # [H3P, 128]
        b4_slab.astype(jnp.float32),                             # [1, 128]
    )
    meta = dict(state_dim=S2 // 2, action_dim=A, digest_dim=D)
    return kparams, meta


# --------------------------------------------------------------------------- #
# Wrapper
# --------------------------------------------------------------------------- #
def _choose_block_b(B, desired):
    # Biggest tile <= desired, but guarantee >= 2 grid steps (megacore / DMA
    # overlap) whenever that does not shrink tiles below 8 rows.
    half = _round_up((B + 1) // 2, 8)
    return max(8, min(desired, half))


def actor_forward(pre_state, state, kparams, meta, *,
                  action_discrete, action_min, action_max,
                  block_b=512, out_dtype=jnp.float32,
                  compute_dtype=jnp.bfloat16, return_fused=False):
    assert isinstance(action_discrete, int), \
        "action_discrete must be a static Python int (selects the kernel branch)"

    B, S = pre_state.shape
    A, D = meta["action_dim"], meta["digest_dim"]

    # Concat ONCE in the wrapper and cast to bf16 (halves input DMA bytes).
    x = jnp.concatenate([pre_state, state], axis=1).astype(compute_dtype)

    block_b = _choose_block_b(B, block_b)
    B_pad = _round_up(B, block_b)
    if B_pad != B:
        x = jnp.pad(x, ((0, B_pad - B), (0, 0)))

    w1, b1, w2, b2, w3, b3, w4, b4 = kparams

    def row_spec(cols):       # batch-tiled arrays
        return pl.BlockSpec((block_b, cols), lambda i: (i, 0))

    def rep_spec(shape):      # weights/biases: constant block -> VMEM resident
        return pl.BlockSpec(shape, lambda i: (0, 0))

    kernel = functools.partial(
        _actor_kernel,
        action_discrete=action_discrete,
        action_min=float(action_min),
        action_max=float(action_max),
        digest_dim=D,
        action_dim=A,
    )

    fused = pl.pallas_call(
        kernel,
        grid=(B_pad // block_b,),
        out_shape=jax.ShapeDtypeStruct((B_pad, SLAB), out_dtype),
        in_specs=[
            row_spec(x.shape[1]),
            rep_spec(w1.shape), rep_spec(b1.shape),
            rep_spec(w2.shape), rep_spec(b2.shape),
            rep_spec(w3.shape), rep_spec(b3.shape),
            rep_spec(w4.shape), rep_spec(b4.shape),
        ],
        out_specs=row_spec(SLAB),
        compiler_params=pltpu.CompilerParams(
            dimension_semantics=("parallel",)),
    )(x, w1, b1, w2, b2, w3, b3, w4, b4)

    if return_fused:
        return fused  # digest = fused[:B, :D], action = fused[:B, D:D+A]
    return fused[:B, D:D + A], fused[:B, :D]


# --------------------------------------------------------------------------- #
# Init + pure-JAX reference
# --------------------------------------------------------------------------- #
def init_params(key, state_dim, action_dim, digest_dim=32):
    """Weights ~ N(0, 0.1) (matching .normal_(0, 0.1)); biases ~ U(+-1/sqrt(fan_in)).
    Weights are stored [in_features, out_features] (x @ W + b)."""
    dims = [
        (state_dim * 2, state_dim * 8),   # State.fc1
        (state_dim * 8, digest_dim),      # State.fc2
        (digest_dim, 64),                 # Actor.fc2
        (64, action_dim),                 # Actor.fc3
    ]
    params = []
    for (fan_in, fan_out) in dims:
        key, kw, kb = jax.random.split(key, 3)
        w = 0.1 * jax.random.normal(kw, (fan_in, fan_out), dtype=jnp.float32)
        bound = 1.0 / jnp.sqrt(fan_in)
        b = jax.random.uniform(kb, (1, fan_out), dtype=jnp.float32,
                               minval=-bound, maxval=bound)
        params += [w, b]
    return params


def reference_forward(pre_state, state, params, *, action_discrete, action_min,
                      action_max, compute_dtype=jnp.bfloat16):
    """Pure-JAX reference applying the same bf16-at-dot casts as the kernel."""
    w1, b1, w2, b2, w3, b3, w4, b4 = params

    def mm(x, w):
        return jnp.dot(x.astype(compute_dtype), w.astype(compute_dtype),
                       preferred_element_type=jnp.float32)

    x = jnp.concatenate([pre_state, state], axis=1)
    h1 = jnp.maximum(mm(x, w1) + b1, 0.0)
    dg = jnp.maximum(mm(h1, w2) + b2, 0.0)
    h3 = jnp.maximum(mm(dg, w3) + b3, 0.0)
    logits = mm(h3, w4) + b4
    if action_discrete == 0:
        a = (1.0 + jnp.tanh(logits)) / 2.0 * (action_max - action_min) + action_min
    else:
        a = jax.nn.softmax(logits, axis=1)
    return a, dg


# --------------------------------------------------------------------------- #
if __name__ == "__main__":
    B = 256          # small demo batch; block_b clamp -> 128-row tiles, grid=2
    STATE_DIM = 16
    ACTION_DIM = 4
    ACTION_MIN = -1.0
    ACTION_MAX = 1.0

    key = jax.random.PRNGKey(0)
    key, k_pre, k_st, k_p = jax.random.split(key, 4)
    pre_state = jax.random.normal(k_pre, (B, STATE_DIM), dtype=jnp.float32)
    state = jax.random.normal(k_st, (B, STATE_DIM), dtype=jnp.float32)

    params = init_params(k_p, STATE_DIM, ACTION_DIM)
    kparams, meta = prepare_params(params)

    ok = True
    for action_discrete in (0, 1):
        a, digest = actor_forward(pre_state, state, kparams, meta,
                                  action_discrete=action_discrete,
                                  action_min=ACTION_MIN, action_max=ACTION_MAX)
        a = jax.block_until_ready(a)
        digest = jax.block_until_ready(digest)

        a_ref, d_ref = reference_forward(pre_state, state, params,
                                         action_discrete=action_discrete,
                                         action_min=ACTION_MIN,
                                         action_max=ACTION_MAX)
        # Tolerance covers bf16 dot operands.
        ok &= bool(jnp.allclose(a, a_ref, atol=2e-3, rtol=2e-3))
        ok &= bool(jnp.allclose(digest, d_ref, atol=2e-3, rtol=2e-3))

    if ok:
        print("KERNEL_OK")
    else:
        print("MISMATCH")
</pallas_src>

<mosaic_0001>
module attributes {stable_mosaic.version = 11 : i64} {
  func.func @_actor_kernel(%arg0: i32, %arg1: memref<128x32xbf16, #tpu.memory_space<vmem>>, %arg2: memref<32x128xbf16, #tpu.memory_space<vmem>>, %arg3: memref<1x128xf32, #tpu.memory_space<vmem>>, %arg4: memref<128x128xbf16, #tpu.memory_space<vmem>>, %arg5: memref<1x128xf32, #tpu.memory_space<vmem>>, %arg6: memref<128x128xbf16, #tpu.memory_space<vmem>>, %arg7: memref<1x128xf32, #tpu.memory_space<vmem>>, %arg8: memref<128x128xbf16, #tpu.memory_space<vmem>>, %arg9: memref<1x128xf32, #tpu.memory_space<vmem>>, %arg10: memref<128x128xf32, #tpu.memory_space<vmem>>) attributes {dimension_semantics = [#tpu.dimension_semantics<parallel>], iteration_bounds = array<i64: 2>, scalar_prefetch = 0 : i64, scratch_operands = 0 : i64, tpu.core_type = #tpu.core_type<tc>, window_params = [{transform_indices = @transform_0, window_bounds = array<i64: 128, 32>}, {pipeline_mode = #tpu.pipeline_mode<synchronous>, transform_indices = @transform_1, window_bounds = array<i64: 32, 128>}, {pipeline_mode = #tpu.pipeline_mode<synchronous>, transform_indices = @transform_2, window_bounds = array<i64: 1, 128>}, {pipeline_mode = #tpu.pipeline_mode<synchronous>, transform_indices = @transform_3, window_bounds = array<i64: 128, 128>}, {pipeline_mode = #tpu.pipeline_mode<synchronous>, transform_indices = @transform_4, window_bounds = array<i64: 1, 128>}, {pipeline_mode = #tpu.pipeline_mode<synchronous>, transform_indices = @transform_5, window_bounds = array<i64: 128, 128>}, {pipeline_mode = #tpu.pipeline_mode<synchronous>, transform_indices = @transform_6, window_bounds = array<i64: 1, 128>}, {pipeline_mode = #tpu.pipeline_mode<synchronous>, transform_indices = @transform_7, window_bounds = array<i64: 128, 128>}, {pipeline_mode = #tpu.pipeline_mode<synchronous>, transform_indices = @transform_8, window_bounds = array<i64: 1, 128>}, {transform_indices = @transform_9, window_bounds = array<i64: 128, 128>}]} {
    %c0 = arith.constant 0 : index
    %c0_0 = arith.constant 0 : index
    %0 = vector.load %arg1[%c0, %c0_0] : memref<128x32xbf16, #tpu.memory_space<vmem>>, vector<128x32xbf16>
    %c0_1 = arith.constant 0 : index
    %c0_2 = arith.constant 0 : index
    %1 = vector.load %arg2[%c0_1, %c0_2] : memref<32x128xbf16, #tpu.memory_space<vmem>>, vector<32x128xbf16>
    %cst = arith.constant dense<0.000000e+00> : vector<128x128xf32>
    %2 = tpu.matmul %0, %1, %cst {dimension_numbers = #tpu.dot_dimension_numbers<[1], [0], [0], [1], [0, 0, 1, 1], [], []>} : vector<128x32xbf16>, vector<32x128xbf16>, vector<128x128xf32> -> vector<128x128xf32>
    %c0_3 = arith.constant 0 : index
    %c0_4 = arith.constant 0 : index
    %3 = vector.load %arg3[%c0_3, %c0_4] : memref<1x128xf32, #tpu.memory_space<vmem>>, vector<1x128xf32>
    %4 = vector.broadcast %3 : vector<1x128xf32> to vector<128x128xf32>
    %5 = arith.addf %2, %4 : vector<128x128xf32>
    %cst_5 = arith.constant 0.000000e+00 : f32
    %6 = vector.broadcast %cst_5 : f32 to vector<128x128xf32>
    %7 = arith.maximumf %5, %6 : vector<128x128xf32>
    %8 = arith.truncf %7 : vector<128x128xf32> to vector<128x128xbf16>
    %c0_6 = arith.constant 0 : index
    %c0_7 = arith.constant 0 : index
    %9 = vector.load %arg4[%c0_6, %c0_7] : memref<128x128xbf16, #tpu.memory_space<vmem>>, vector<128x128xbf16>
    %cst_8 = arith.constant dense<0.000000e+00> : vector<128x128xf32>
    %10 = tpu.matmul %8, %9, %cst_8 {dimension_numbers = #tpu.dot_dimension_numbers<[1], [0], [0], [1], [0, 0, 1, 1], [], []>} : vector<128x128xbf16>, vector<128x128xbf16>, vector<128x128xf32> -> vector<128x128xf32>
    %c0_9 = arith.constant 0 : index
    %c0_10 = arith.constant 0 : index
    %11 = vector.load %arg5[%c0_9, %c0_10] : memref<1x128xf32, #tpu.memory_space<vmem>>, vector<1x128xf32>
    %12 = vector.broadcast %11 : vector<1x128xf32> to vector<128x128xf32>
    %13 = arith.addf %10, %12 : vector<128x128xf32>
    %cst_11 = arith.constant 0.000000e+00 : f32
    %14 = vector.broadcast %cst_11 : f32 to vector<128x128xf32>
    %15 = arith.maximumf %13, %14 : vector<128x128xf32>
    %16 = arith.truncf %15 : vector<128x128xf32> to vector<128x128xbf16>
    %c0_12 = arith.constant 0 : index
    %c0_13 = arith.constant 0 : index
    %17 = vector.load %arg6[%c0_12, %c0_13] : memref<128x128xbf16, #tpu.memory_space<vmem>>, vector<128x128xbf16>
    %cst_14 = arith.constant dense<0.000000e+00> : vector<128x128xf32>
    %18 = tpu.matmul %16, %17, %cst_14 {dimension_numbers = #tpu.dot_dimension_numbers<[1], [0], [0], [1], [0, 0, 1, 1], [], []>} : vector<128x128xbf16>, vector<128x128xbf16>, vector<128x128xf32> -> vector<128x128xf32>
    %c0_15 = arith.constant 0 : index
    %c0_16 = arith.constant 0 : index
    %19 = vector.load %arg7[%c0_15, %c0_16] : memref<1x128xf32, #tpu.memory_space<vmem>>, vector<1x128xf32>
    %20 = vector.broadcast %19 : vector<1x128xf32> to vector<128x128xf32>
    %21 = arith.addf %18, %20 : vector<128x128xf32>
    %cst_17 = arith.constant 0.000000e+00 : f32
    %22 = vector.broadcast %cst_17 : f32 to vector<128x128xf32>
    %23 = arith.maximumf %21, %22 : vector<128x128xf32>
    %24 = arith.truncf %23 : vector<128x128xf32> to vector<128x128xbf16>
    %c0_18 = arith.constant 0 : index
    %c0_19 = arith.constant 0 : index
    %25 = vector.load %arg8[%c0_18, %c0_19] : memref<128x128xbf16, #tpu.memory_space<vmem>>, vector<128x128xbf16>
    %cst_20 = arith.constant dense<0.000000e+00> : vector<128x128xf32>
    %26 = tpu.matmul %24, %25, %cst_20 {dimension_numbers = #tpu.dot_dimension_numbers<[1], [0], [0], [1], [0, 0, 1, 1], [], []>} : vector<128x128xbf16>, vector<128x128xbf16>, vector<128x128xf32> -> vector<128x128xf32>
    %c0_21 = arith.constant 0 : index
    %c0_22 = arith.constant 0 : index
    %27 = vector.load %arg9[%c0_21, %c0_22] : memref<1x128xf32, #tpu.memory_space<vmem>>, vector<1x128xf32>
    %28 = vector.broadcast %27 : vector<1x128xf32> to vector<128x128xf32>
    %29 = arith.addf %26, %28 : vector<128x128xf32>
    %30 = tpu.iota {dimensions = array<i32: 1>} : vector<128x128xi32>
    %31 = math.tanh %29 : vector<128x128xf32>
    %cst_23 = arith.constant 1.000000e+00 : f32
    %32 = vector.broadcast %cst_23 : f32 to vector<128x128xf32>
    %33 = arith.addf %32, %31 : vector<128x128xf32>
    %cst_24 = arith.constant 2.000000e+00 : f32
    %34 = vector.broadcast %cst_24 : f32 to vector<128x128xf32>
    %35 = arith.divf %33, %34 : vector<128x128xf32>
    %cst_25 = arith.constant 2.000000e+00 : f32
    %36 = vector.broadcast %cst_25 : f32 to vector<128x128xf32>
    %37 = arith.mulf %35, %36 : vector<128x128xf32>
    %cst_26 = arith.constant -1.000000e+00 : f32
    %38 = vector.broadcast %cst_26 : f32 to vector<128x128xf32>
    %39 = arith.addf %37, %38 : vector<128x128xf32>
    %c32_i32 = arith.constant 32 : i32
    %40 = vector.broadcast %c32_i32 : i32 to vector<128x128xi32>
    %41 = arith.cmpi slt, %30, %40 : vector<128x128xi32>
    %42 = arith.select %41, %15, %39 : vector<128x128xi1>, vector<128x128xf32>
    %c0_27 = arith.constant 0 : index
    %c0_28 = arith.constant 0 : index
    %43 = vector.load %arg10[%c0_27, %c0_28] : memref<128x128xf32, #tpu.memory_space<vmem>>, vector<128x128xf32>
    tpu.vector_store %arg10[%c0_27, %c0_28], %42 {strides = array<i32>} : memref<128x128xf32, #tpu.memory_space<vmem>>, vector<128x128xf32>,
    return
  }
  func.func @transform_0(%arg0: i32) -> (i32, i32) {
    %c0_i32 = arith.constant 0 : i32
    %c0_i32_0 = arith.constant 0 : i32
    return %arg0, %c0_i32 : i32, i32
  }
  func.func @transform_1(%arg0: i32) -> (i32, i32) {
    %c0_i32 = arith.constant 0 : i32
    %c0_i32_0 = arith.constant 0 : i32
    %c0_i32_1 = arith.constant 0 : i32
    return %c0_i32, %c0_i32_0 : i32, i32
  }
  func.func @transform_2(%arg0: i32) -> (i32, i32) {
    %c0_i32 = arith.constant 0 : i32
    %c0_i32_0 = arith.constant 0 : i32
    %c0_i32_1 = arith.constant 0 : i32
    return %c0_i32, %c0_i32_0 : i32, i32
  }
  func.func @transform_3(%arg0: i32) -> (i32, i32) {
    %c0_i32 = arith.constant 0 : i32
    %c0_i32_0 = arith.constant 0 : i32
    %c0_i32_1 = arith.constant 0 : i32
    return %c0_i32, %c0_i32_0 : i32, i32
  }
  func.func @transform_4(%arg0: i32) -> (i32, i32) {
    %c0_i32 = arith.constant 0 : i32
    %c0_i32_0 = arith.constant 0 : i32
    %c0_i32_1 = arith.constant 0 : i32
    return %c0_i32, %c0_i32_0 : i32, i32
  }
  func.func @transform_5(%arg0: i32) -> (i32, i32) {
    %c0_i32 = arith.constant 0 : i32
    %c0_i32_0 = arith.constant 0 : i32
    %c0_i32_1 = arith.constant 0 : i32
    return %c0_i32, %c0_i32_0 : i32, i32
  }
  func.func @transform_6(%arg0: i32) -> (i32, i32) {
    %c0_i32 = arith.constant 0 : i32
    %c0_i32_0 = arith.constant 0 : i32
    %c0_i32_1 = arith.constant 0 : i32
    return %c0_i32, %c0_i32_0 : i32, i32
  }
  func.func @transform_7(%arg0: i32) -> (i32, i32) {
    %c0_i32 = arith.constant 0 : i32
    %c0_i32_0 = arith.constant 0 : i32
    %c0_i32_1 = arith.constant 0 : i32
    return %c0_i32, %c0_i32_0 : i32, i32
  }
  func.func @transform_8(%arg0: i32) -> (i32, i32) {
    %c0_i32 = arith.constant 0 : i32
    %c0_i32_0 = arith.constant 0 : i32
    %c0_i32_1 = arith.constant 0 : i32
    return %c0_i32, %c0_i32_0 : i32, i32
  }
  func.func @transform_9(%arg0: i32) -> (i32, i32) {
    %c0_i32 = arith.constant 0 : i32
    %c0_i32_0 = arith.constant 0 : i32
    return %arg0, %c0_i32 : i32, i32
  }
}

</mosaic_0001>

<bundles_post_ra>
// kernel: tpu_custom_call.1
= control target key start
LH: loop header
LB: loop body
LE: loop exit
PB: predicated region body
PF: predicated region fallthrough
CT: control target
= control target key end

     0   :  { %14 = vsyncpa [#allocation3], 0  ;;  %s2293_s0 = inlined_call_operand.vmem [shape: bf16[256,32], index: 0, kind: input, shape index: {}]   ;;  %s2294_s1 = inlined_call_operand.vmem [shape: bf16[32,128], index: 1, kind: input, shape index: {}]   ;;  %s2295_s2 = inlined_call_operand.vmem [shape: f32[1,128], index: 2, kind: input, shape index: {}]   ;;  %s2296_s3 = inlined_call_operand.vmem [shape: bf16[128,128], index: 3, kind: input, shape index: {}]   ;;  %s2297_s4 = inlined_call_operand.vmem [shape: f32[1,128], index: 4, kind: input, shape index: {}]   ;;  %s2298_s5 = inlined_call_operand.vmem [shape: bf16[128,128], index: 5, kind: input, shape index: {}]   ;;  %s2299_s6 = inlined_call_operand.vmem [shape: f32[1,128], index: 6, kind: input, shape index: {}]   ;;  %s2300_s7 = inlined_call_operand.hbm [shape: bf16[128,128], index: 7, kind: input, shape index: {}]   ;;  %s2301_s8 = inlined_call_operand.vmem [shape: f32[1,128], index: 8, kind: input, shape index: {}]   ;;  %s2302_s9 = inlined_call_operand.hbm [shape: f32[256,128], index: 9, kind: output, shape index: {}]  }
   0x1   :  { %15 = vsyncpa [#allocation4], 0 }
   0x2   :  { %17 = vsyncpa [#allocation4 + $0x1], 0  ;;  %s1854_s30 = smov 0   ;;  %s1856_s10 = smov 0  }
   0x3   :  { %s1858_s11 = smov 0   ;;  %s1860_s12 = smov 0  }
   0x4 LB: > { %s1875_s13 = sadd.s32 4294967295, %s1796_s12   ;;  %s1331_s14 = sadd.s32 4294967294, %s1796_s12   ;;  %s1796_s12 = sphi %s1860_s12, %s2318_s12   ;;  %s1792_s11 = sphi %s1858_s11, %s2317_s11   ;;  %s1788_s10 = sphi %s1856_s10, %s2316_s10   ;;  %s1784_s30 = sphi %s1854_s30, %s2315_s30  }
   0x5   : > { %s1879_s15 = sadd.s32 1, %s1796_s12   ;;  %s224_s16 = sadd.s32 1, %s1792_s11 }
   0x6   : > { %s221_s17 = ssub.s32 %s1796_s12, %s1879_s15  ;;  %p234_p0 = scmp.ne.s32.totalorder %s1792_s11, %s1788_s10 }
   0x7   : > { %p222_p1 = scmp.eq.s32.totalorder %s221_s17, 0  ;;  %p235_p2 = scmp.eq.s32.totalorder %s1875_s13, 1 }
   0x8   : > { %p240_p3 = scmp.ne.s32.totalorder %s1788_s10, %s1784_s30  ;;  %p241_p4 = scmp.eq.s32.totalorder %s1331_s14, 1 }
   0x9   : > { %s1890_s18 = scalar_select %p222_p1, %s1792_s11, %s224_s16  }
   0xa   : > { %p1892_p5 = por %p235_p2, %p234_p0  ;;  %p1896_p6 = por %p241_p4, %p240_p3 }
   0xb   : > { %p1332_p7 = scmp.ge.s32.totalorder %s1796_s12, 1  ;;  %p248_p8 = scmp.lt.s32.totalorder %s1796_s12, 3 }
   0xc   : > { %s2306_s19 = scalar_select %p1892_p5, 1, 0 }
   0xd   : > { %s2307_s20 = scalar_select %p1896_p6, 1, 0 }
   0xe   : > { %p2303_p9 = scmp.eq.s32.totalorder %s1875_s13, 0  ;;  %p1903_p10 = pnand %p1332_p7, %p248_p8 }
   0xf   : > { %s1798_s22 = smov [#allocation2]   ;;  %s1702_s27 = scalar_lea.hbm %s2300_s7, 1024 }
  0x10   : > { %s2308_s21 = scalar_select %p1903_p10, 1, 0 }
  0x11   : > { %s278_s23 = sshll.u32 %s1798_s22, 4  ;;  %p1588_p11 = pneg %p1903_p10  ;;  %s279_s23 = int_to_ptr.vmem [resolvable:$true] %s278_s23 }
  0x12   : > { %p1703_p13 = scmp.ne.s32.totalorder %s2300_s7, %s1702_s27  ;;  %p1709_p3 = scmp.lt.u32.totalorder %s1702_s27, %s2300_s7 }
  0x13   : > { %p1911_p12 = pnand %p2303_p9, %p1588_p11 }
  0x15   : > { %p1704_p0 = pneg %p1911_p12 }
  0x17   : > { %p1705_p1 = pnand %p1704_p0, %p1703_p13 }
  0x19   : > { %p1706_p2 = pneg %p1705_p1 }
  0x1b   : > { %p1711_p4 = pnand %p1709_p3, %p1706_p2 }
  0x1d   : > { %1714 = shalt.err (!%p1711_p4)
}
  0x1e   : > { %s1715_s17 = scalar_lea.vmem %s279_s23, 1024  ;;  %p1723_p9 = scmp.lt.s32.totalorder %s279_s23, %s279_s23 }
  0x1f   : > { %p1716_p7 = scmp.ne.s32.totalorder %s279_s23, %s1715_s17  ;;  %p1724_p6 = scmp.lt.s32.totalorder %s1715_s17, %s1715_s17 }
  0x21   : > { %p1718_p8 = pnand %p1716_p7, %p1704_p0  ;;  %p1725_p5 = por %p1724_p6, %p1723_p9 }
  0x23   : > { %p1719_p11 = pneg %p1718_p8 }
  0x25   : > { %p1726_p10 = pnand %p1725_p5, %p1719_p11 }
  0x27   : > { %1729 = shalt.err (!%p1726_p10)
}
  0x28   : > { %s1799_s22 = smov 64   ;;  %s1800_s25 = smov 4  }
  0x29   : > { %1591 = dma.hbm_to_vmem [thread:$0]  (!%p1911_p12), %s2300_s7, 1024, %s279_s23, [#allocation3], %s1799_s22, %s1799_s22, %s1800_s25  }
  0x2a   : > { %p2310_p13 = scmp.ne.s32.totalorder %s2308_s21, 0 }
  0x2b   : > { %p2311_p1 = scmp.eq.s32.totalorder (!%p2310_p13), %s1875_s13, 0 }
  0x2c   : > { %306 = sbr.rel (%p2310_p13) target bundleno = 1003 (0x3eb), region = 56 }
  0x33   : > { %1775 = dma.done.wait (%p2311_p1), [#allocation3], 1024   ;;  %p2312_p0 = pmov %p2311_p1 }
  0x34   : > { %s1338_s27 = sshll.u32 %s1875_s13, 4  ;;  %v1636_v0 = vld [vmem:[%s2294_s1] sm:$0xff]   ;;  %v1637_v1 = vld [vmem:[%s2294_s1 + $0x8] sm:$0xff]   ;;  %vm429_vm0 = vcmask 261120   ;;  %v1648_v8 = vld [vmem:[%s2296_s3 + $0x10] sm:$0xff]   ;;  %s339_s14 = sand.u32 1, %s1788_s10  }
  0x35   : > { %1777 = vsyncadd (%p2312_p0), [#allocation3], 4294966272  ;;  %p343_p5 = scmp.lt.s32.totalorder %s1338_s27, 31  ;;  %1450 = vmatprep.subr.bf16.mxu0 %v1636_v0  ;;  %v1646_v5 = vld [vmem:[%s2296_s3] sm:$0xff]   ;;  %v1647_v6 = vld [vmem:[%s2296_s3 + $0x8] sm:$0xff]   ;;  %s1337_s24 = sshll.u32 %s339_s14, 7 }
  0x36   : > { %1451 = vmatpush3.bf16.msra.mxu0 %v1636_v0  ;;  %1470 = vmatprep.subr.bf16.mxu1 %v1646_v5  ;;  %v1649_v10 = vld [vmem:[%s2296_s3 + $0x18] sm:$0xff]   ;;  %v1650_v12 = vld [vmem:[%s2296_s3 + $0x20] sm:$0xff]   ;;  %v1651_v14 = vld [vmem:[%s2296_s3 + $0x28] sm:$0xff]   ;;  %s1391_s23 = sshll.u32 %s1875_s13, 11  ;;  %s2252_s25 = scalar_lea.sflag [#allocation4], %s339_s14 }
  0x37   : > { %s2320_s27 = smov (!%p343_p5, %s1338_s27), 31  ;;  %1452 = vmatprep.subr.bf16.mxu0 %v1637_v1  ;;  %1471 = vmatpush3.bf16.msra.mxu1 %v1646_v5  ;;  %v1652_v16 = vld [vmem:[%s2296_s3 + $0x30] sm:$0xff]   ;;  %v1653_v17 = vld [vmem:[%s2296_s3 + $0x38] sm:$0xff]   ;;  %v1654_v18 = vld [vmem:[%s2298_s5] sm:$0xff]   ;;  %s2235_s22 = scalar_lea.hbm %s2302_s9, %s1391_s23 }
  0x38   : > { %s1339_s29 = sshll.u32 %s2320_s27, 2  ;;  %1472 = vmatprep.subr.bf16.mxu1 %v1647_v6  ;;  %v1655_v19 = vld [vmem:[%s2298_s5 + $0x8] sm:$0xff]   ;;  %v1656_v20 = vld [vmem:[%s2298_s5 + $0x10] sm:$0xff]   ;;  %v1657_v21 = vld [vmem:[%s2298_s5 + $0x18] sm:$0xff]   ;;  %p2313_p9 = scmp.ne.s32.totalorder %s2306_s19, 0 }
  0x39   : > { %s1941_s16 = scalar_lea.vmem %s2293_s0, %s1339_s29  ;;  %v1658_v22 = vld [vmem:[%s2298_s5 + $0x20] sm:$0xff]   ;;  %v1659_v23 = vld [vmem:[%s2298_s5 + $0x28] sm:$0xff]   ;;  %s1801_s28 = smov [#allocation5]  }
  0x3a   : > { %v1638_v2 = vld [vmem:[%s1941_s16] sm:$0xff]   ;;  %v1639_v3 = vld [vmem:[%s1941_s16 + $0x8] sm:$0xff]   ;;  %1453 = vmatpush3.bf16.msra.mxu0 %v1637_v1  ;;  %v1640_v4 = vld [vmem:[%s1941_s16 + $0x10] sm:$0xff]   ;;  %s1734_s27 = sshll.u32 %s1801_s28, 4  ;;  %s1735_s27 = int_to_ptr.vmem [resolvable:$false] %s1734_s27 }
  0x3b   : > { %1454 = vmatprep.mubr.msk.bf16.mxu0 %vm429_vm0, %v1638_v2  ;;  %v1641_v7 = vld [vmem:[%s1941_s16 + $0x18] sm:$0xff]   ;;  %v1642_v9 = vld [vmem:[%s1941_s16 + $0x20] sm:$0xff]   ;;  %1473 = vmatpush3.bf16.msra.mxu1 %v1647_v6  ;;  %v1643_v11 = vld [vmem:[%s1941_s16 + $0x28] sm:$0xff]   ;;  %s1736_s29 = scalar_lea.vmem %s1735_s27, 4096 }
  0x3c   : > { %1474 = vmatprep.subr.bf16.mxu1 %v1648_v8  ;;  %v1644_v13 = vld [vmem:[%s1941_s16 + $0x30] sm:$0xff]   ;;  %v1645_v15 = vld [vmem:[%s1941_s16 + $0x38] sm:$0xff]   ;;  %1502 = vmatprep.subr.bf16.mxu0 %v1654_v18  ;;  %v1340_v24 = vld [vmem:[%s2295_s2] ss:$0 sm:$0xff]  ;;  %s2159_s16 = scalar_lea.vmem [#allocation5], %s1337_s24 }
  0x3d   : > { %1455 = vmatmul.mubr.msk.bf16.vlgmr.msra.gmra.mrb[0].mxu0 %vm429_vm0, %v1639_v3  ;;  %s1257_s17 = sshll.u32 %s2159_s16, 4  ;;  %s2237_s17 = int_to_ptr.vmem [resolvable:$true] %s1257_s17 }
  0x3e   : > { %1458 = vmatprep.mubr.msk.bf16.mxu0 %vm429_vm0, %v1640_v4  ;;  %1503 = vmatpush3.bf16.msra.mxu0 %v1654_v18  ;;  %v1661_v18 = vld [vmem:[%s2298_s5 + $0x38] sm:$0xff]   ;;  %s1730_s26 = scalar_lea.vmem %s2237_s17, 2048  ;;  %p1737_p2 = scmp.lt.s32.totalorder %s2237_s17, %s1735_s27 }
  0x3f   : > { %1475 = vmatpush3.bf16.msra.mxu1 %v1648_v8  ;;  %1504 = vmatprep.subr.bf16.mxu0 %v1655_v19  ;;  %p1731_p6 = scmp.ne.s32.totalorder %s2237_s17, %s1730_s26  ;;  %p1738_p3 = scmp.lt.s32.totalorder %s1736_s29, %s1730_s26 }
  0x40   : > { %1476 = vmatprep.subr.bf16.mxu1 %v1649_v10 }
  0x41   : > { %p1732_p10 = pnand %p1731_p6, %p2313_p9  ;;  %p1739_p4 = por %p1738_p3, %p1737_p2 }
  0x42   : > { %1505 = vmatpush3.bf16.msra.mxu0 %v1655_v19  ;;  %v1662_v19 = vld [vmem:[#allocation2] sm:$0xff]  }
  0x43   : > { %1477 = vmatpush3.bf16.msra.mxu1 %v1649_v10  ;;  %1506 = vmatprep.subr.bf16.mxu0 %v1656_v20  ;;  %p1733_p12 = pneg %p1732_p10 }
  0x44   : > { %1478 = vmatprep.subr.bf16.mxu1 %v1650_v12 }
  0x45   : > { %1459 = vmatmul.mubr.msk.bf16.gmra.mrb[4].mxu0 %vm429_vm0, %v1641_v7  ;;  %p1740_p7 = pnand %p1739_p4, %p1733_p12 }
  0x46   : > { %1462 = vmatprep.mubr.msk.bf16.mxu0 %vm429_vm0, %v1642_v9  ;;  %1507 = vmatpush3.bf16.msra.mxu0 %v1656_v20  ;;  %v1663_v20 = vld [vmem:[#allocation2 + $0x8] sm:$0xff]  }
  0x47   : > { %1479 = vmatpush3.bf16.msra.mxu1 %v1650_v12  ;;  %1508 = vmatprep.subr.bf16.mxu0 %v1657_v21 }
  0x48   : > { %1480 = vmatprep.subr.bf16.mxu1 %v1651_v14 }
  0x4a   : > { %1509 = vmatpush3.bf16.msra.mxu0 %v1657_v21  ;;  %v1664_v21 = vld [vmem:[#allocation2 + $0x10] sm:$0xff]  }
  0x4b   : > { %1481 = vmatpush3.bf16.msra.mxu1 %v1651_v14  ;;  %1510 = vmatprep.subr.bf16.mxu0 %v1658_v22 }
  0x4c   : > { %1482 = vmatprep.subr.bf16.mxu1 %v1652_v16 }
  0x4d   : > { %1463 = vmatmul.mubr.msk.bf16.gmra.mrb[8].mxu0 %vm429_vm0, %v1643_v11 }
  0x4e   : > { %1466 = vmatprep.mubr.msk.bf16.mxu0 %vm429_vm0, %v1644_v13  ;;  %1511 = vmatpush3.bf16.msra.mxu0 %v1658_v22  ;;  %v1665_v22 = vld [vmem:[#allocation2 + $0x18] sm:$0xff]  }
  0x4f   : > { %1483 = vmatpush3.bf16.msra.mxu1 %v1652_v16  ;;  %1512 = vmatprep.subr.bf16.mxu0 %v1659_v23 }
  0x50   : > { %1484 = vmatprep.subr.bf16.mxu1 %v1653_v17 }
  0x52   : > { %1513 = vmatpush3.bf16.msra.mxu0 %v1659_v23  ;;  %v2016_v23 = vld [vmem:[#allocation2 + $0x20] sm:$0xff]  }
  0x53   : > { %1485 = vmatpush3.bf16.msra.mxu1 %v1653_v17  ;;  %v1660_v17 = vld [vmem:[%s2298_s5 + $0x30] sm:$0xff]  }
  0x54   : > { %1514 = vmatprep.subr.bf16.mxu0 %v1660_v17  ;;  %1566 = vmatprep.subr.bf16.mxu1 %v1662_v19 }
  0x55   : > { %1467 = vmatmul.mubr.msk.bf16.gmra.mrb[12].mxu0 %vm429_vm0, %v1645_v15 }
  0x56   : > { %1515 = vmatpush3.bf16.msra.mxu0 %v1660_v17 }
  0x57   : > { %1516 = vmatprep.subr.bf16.mxu0 %v1661_v18 }
  0x5a   : > { %1517 = vmatpush3.bf16.msra.mxu0 %v1661_v18  ;;  %v1668_v18 = vld [vmem:[#allocation2 + $0x30] sm:$0xff]  }
  0x5b   : > { %1534 = vmatprep.subr.bf16.mxu0 %v1662_v19 }
 0x110   : > { %v1456_v25 = vpop.f32.mrb[0].mxu0 }
 0x111   : > { %v497_v26 = vadd.f32 %v1456_v25, %v1340_v24  ;;  %v488_v27 = vpop.f32.mrb[1].mxu0  ;;  %v2027_v25 = vld [vmem:[%s2297_s4] ss:$0 sm:$0xff] }
 0x112   : > { %v489_v28 = vadd.f32 %v1340_v24, %v488_v27  ;;  %v1457_v29 = vpop.f32.mrb[2].mxu0 }
 0x113   : > { %v500_v30 = vadd.f32 %v1457_v29, %v1340_v24  ;;  %v491_v31 = vpop.f32.mrb[3].mxu0  ;;  %v553_v33 = vmax.f32 %v497_v26, 0.0 }
 0x114   : > { %v492_v32 = vadd.f32 %v1340_v24, %v491_v31  ;;  %v551_v35 = vmax.f32 %v489_v28, 0.0 }
 0x115   : > { %v554_v34 = vmax.f32 %v500_v30, 0.0 }
 0x116   : > { %v552_v36 = vmax.f32 %v492_v32, 0.0 }
 0x117   : > { %v568_v37 = vpack.c.bf16 %v554_v34, %v553_v33 }
 0x118   : > { %v1460_v38 = vpop.f32.mrb[4].mxu0  ;;  %v567_v39 = vpack.c.bf16 %v552_v36, %v551_v35 }
 0x119   : > { %v513_v40 = vadd.f32 %v1460_v38, %v1340_v24  ;;  %v504_v41 = vpop.f32.mrb[5].mxu0 }
 0x11a   : > { %v505_v42 = vadd.f32 %v1340_v24, %v504_v41  ;;  %v1461_v43 = vpop.f32.mrb[6].mxu0  ;;  %1486 = vmatprep.mubr.bf16.mxu1 %v567_v39 }
 0x11b   : > { %v516_v44 = vadd.f32 %v1461_v43, %v1340_v24  ;;  %v507_v45 = vpop.f32.mrb[7].mxu0  ;;  %1487 = vmatmul.mubr.bf16.vlgmr.msra.gmra.mrb[0].mxu1 %v568_v37  ;;  %v557_v47 = vmax.f32 %v513_v40, 0.0 }
 0x11c   : > { %v508_v46 = vadd.f32 %v1340_v24, %v507_v45  ;;  %v555_v49 = vmax.f32 %v505_v42, 0.0  ;;  %1574 = vmatpush3.bf16.msra.mxu1 %v1662_v19 }
 0x11d   : > { %v558_v48 = vmax.f32 %v516_v44, 0.0  ;;  %1567 = vmatprep.subr.bf16.mxu1 %v1663_v20 }
 0x11e   : > { %v556_v50 = vmax.f32 %v508_v46, 0.0 }
 0x11f   : > { %v570_v51 = vpack.c.bf16 %v558_v48, %v557_v47 }
 0x120   : > { %v569_v52 = vpack.c.bf16 %v556_v50, %v555_v49  ;;  %v1464_v53 = vpop.f32.mrb[8].mxu0  ;;  %1575 = vmatpush3.bf16.msra.mxu1 %v1663_v20 }
 0x121   : > { %v529_v54 = vadd.f32 %v1464_v53, %v1340_v24  ;;  %v520_v55 = vpop.f32.mrb[9].mxu0  ;;  %1568 = vmatprep.subr.bf16.mxu1 %v1664_v21 }
 0x122   : > { %v521_v56 = vadd.f32 %v1340_v24, %v520_v55  ;;  %v1465_v57 = vpop.f32.mrb[10].mxu0  ;;  %1490 = vmatprep.mubr.bf16.mxu1 %v569_v52 }
 0x123   : > { %v532_v58 = vadd.f32 %v1465_v57, %v1340_v24  ;;  %v523_v59 = vpop.f32.mrb[11].mxu0  ;;  %1491 = vmatmul.mubr.bf16.gmra.mrb[4].mxu1 %v570_v51  ;;  %v561_v61 = vmax.f32 %v529_v54, 0.0 }
 0x124   : > { %v524_v60 = vadd.f32 %v1340_v24, %v523_v59  ;;  %v559_v63 = vmax.f32 %v521_v56, 0.0  ;;  %1576 = vmatpush3.bf16.msra.mxu1 %v1664_v21 }
 0x125   : > { %v562_v62 = vmax.f32 %v532_v58, 0.0  ;;  %1569 = vmatprep.subr.bf16.mxu1 %v1665_v22 }
 0x126   : > { %v560_v0 = vmax.f32 %v524_v60, 0.0 }
 0x127   : > { %v572_v1 = vpack.c.bf16 %v562_v62, %v561_v61 }
 0x128   : > { %v571_v2 = vpack.c.bf16 %v560_v0, %v559_v63  ;;  %v1468_v3 = vpop.f32.mrb[12].mxu0  ;;  %1577 = vmatpush3.bf16.msra.mxu1 %v1665_v22 }
 0x129   : > { %v545_v4 = vadd.f32 %v1468_v3, %v1340_v24  ;;  %v536_v5 = vpop.f32.mrb[13].mxu0  ;;  %1570 = vmatprep.subr.bf16.mxu1 %v2016_v23 }
 0x12a   : > { %v537_v6 = vadd.f32 %v1340_v24, %v536_v5  ;;  %v1469_v7 = vpop.f32.mrb[14].mxu0  ;;  %1494 = vmatprep.mubr.bf16.mxu1 %v571_v2 }
 0x12b   : > { %v548_v8 = vadd.f32 %v1469_v7, %v1340_v24  ;;  %v539_v9 = vpop.f32.mrb[15].mxu0  ;;  %1495 = vmatmul.mubr.bf16.gmra.mrb[8].mxu1 %v572_v1  ;;  %v565_v11 = vmax.f32 %v545_v4, 0.0 }
 0x12c   : > { %v540_v10 = vadd.f32 %v1340_v24, %v539_v9  ;;  %v563_v13 = vmax.f32 %v537_v6, 0.0  ;;  %v2019_v24 = vld [vmem:[#allocation2 + $0x28] sm:$0xff]   ;;  %1578 = vmatpush3.bf16.msra.mxu1 %v2016_v23 }
 0x12d   : > { %v566_v12 = vmax.f32 %v548_v8, 0.0  ;;  %1571 = vmatprep.subr.bf16.mxu1 %v2019_v24 }
 0x12e   : > { %v564_v14 = vmax.f32 %v540_v10, 0.0 }
 0x12f   : > { %v574_v15 = vpack.c.bf16 %v566_v12, %v565_v11 }
 0x130   : > { %v573_v16 = vpack.c.bf16 %v564_v14, %v563_v13  ;;  %1579 = vmatpush3.bf16.msra.mxu1 %v2019_v24 }
 0x131   : > { %1572 = vmatprep.subr.bf16.mxu1 %v1668_v18 }
 0x132   : > { %1498 = vmatprep.mubr.bf16.mxu1 %v573_v16 }
 0x133   : > { %1499 = vmatmul.mubr.bf16.gmra.mrb[12].mxu1 %v574_v15 }
 0x134   : > { %1580 = vmatpush3.bf16.msra.mxu1 %v1668_v18 }
 0x1ee   : > { %v1488_v26 = vpop.f32.mrb[0].mxu1 }
 0x1ef   : > { %v680_v27 = vpop.f32.mrb[1].mxu1  ;;  %v2033_v30 = vadd.f32 %v1488_v26, %v2027_v25 }
 0x1f0   : > { %v2030_v28 = vadd.f32 %v2027_v25, %v680_v27  ;;  %v1489_v29 = vpop.f32.mrb[2].mxu1 }
 0x1f1   : > { %v2036_v31 = vadd.f32 %v1489_v29, %v2027_v25  ;;  %v683_v32 = vpop.f32.mrb[3].mxu1  ;;  %v745_v37 = vmax.f32 %v2033_v30, 0.0 }
 0x1f2   : > { %v2039_v33 = vadd.f32 %v2027_v25, %v683_v32  ;;  %v743_v35 = vmax.f32 %v2030_v28, 0.0 }
 0x1f3   : > { %v746_v34 = vmax.f32 %v2036_v31, 0.0 }
 0x1f4   : > { %v744_v36 = vmax.f32 %v2039_v33, 0.0 }
 0x1f5   : > { %v760_v40 = vpack.c.bf16 %v746_v34, %v745_v37 }
 0x1f6   : > { %v759_v38 = vpack.c.bf16 %v744_v36, %v743_v35  ;;  %v1492_v39 = vpop.f32.mrb[4].mxu1 }
 0x1f7   : > { %v696_v41 = vpop.f32.mrb[5].mxu1  ;;  %v2057_v44 = vadd.f32 %v1492_v39, %v2027_v25 }
 0x1f8   : > { %v2054_v42 = vadd.f32 %v2027_v25, %v696_v41  ;;  %v1493_v43 = vpop.f32.mrb[6].mxu1  ;;  %1518 = vmatprep.mubr.bf16.mxu0 %v759_v38 }
 0x1f9   : > { %v2060_v45 = vadd.f32 %v1493_v43, %v2027_v25  ;;  %v699_v46 = vpop.f32.mrb[7].mxu1  ;;  %1519 = vmatmul.mubr.bf16.vlgmr.msra.gmra.mrb[16].mxu0 %v760_v40  ;;  %v749_v51 = vmax.f32 %v2057_v44, 0.0 }
 0x1fa   : > { %v2063_v47 = vadd.f32 %v2027_v25, %v699_v46  ;;  %1535 = vmatpush3.bf16.msra.mxu0 %v1662_v19  ;;  %v747_v49 = vmax.f32 %v2054_v42, 0.0  ;;  %v1669_v19 = vld [vmem:[#allocation2 + $0x38] sm:$0xff]  }
 0x1fb   : > { %v750_v48 = vmax.f32 %v2060_v45, 0.0  ;;  %1536 = vmatprep.subr.bf16.mxu0 %v1663_v20  ;;  %1573 = vmatprep.subr.bf16.mxu1 %v1669_v19 }
 0x1fc   : > { %v748_v50 = vmax.f32 %v2063_v47, 0.0  ;;  %1581 = vmatpush3.bf16.msra.mxu1 %v1669_v19 }
 0x1fd   : > { %v762_v54 = vpack.c.bf16 %v750_v48, %v749_v51 }
 0x1fe   : > { %v761_v52 = vpack.c.bf16 %v748_v50, %v747_v49  ;;  %v1496_v53 = vpop.f32.mrb[8].mxu1  ;;  %1537 = vmatpush3.bf16.msra.mxu0 %v1663_v20  ;;  %v1368_v20 = vld [vmem:[%s2299_s6] ss:$0 sm:$0xff] }
 0x1ff   : > { %v712_v55 = vpop.f32.mrb[9].mxu1  ;;  %1538 = vmatprep.subr.bf16.mxu0 %v1664_v21  ;;  %v2081_v58 = vadd.f32 %v1496_v53, %v2027_v25 }
 0x200   : > { %v2078_v56 = vadd.f32 %v2027_v25, %v712_v55  ;;  %v1497_v57 = vpop.f32.mrb[10].mxu1  ;;  %1522 = vmatprep.mubr.bf16.mxu0 %v761_v52 }
 0x201   : > { %v2084_v59 = vadd.f32 %v1497_v57, %v2027_v25  ;;  %v715_v60 = vpop.f32.mrb[11].mxu1  ;;  %1523 = vmatmul.mubr.bf16.gmra.mrb[20].mxu0 %v762_v54  ;;  %v753_v1 = vmax.f32 %v2081_v58, 0.0 }
 0x202   : > { %v2087_v61 = vadd.f32 %v2027_v25, %v715_v60  ;;  %1539 = vmatpush3.bf16.msra.mxu0 %v1664_v21  ;;  %v751_v63 = vmax.f32 %v2078_v56, 0.0 }
 0x203   : > { %v754_v62 = vmax.f32 %v2084_v59, 0.0  ;;  %1540 = vmatprep.subr.bf16.mxu0 %v1665_v22 }
 0x204   : > { %v752_v0 = vmax.f32 %v2087_v61, 0.0 }
 0x205   : > { %v764_v4 = vpack.c.bf16 %v754_v62, %v753_v1 }
 0x206   : > { %v763_v2 = vpack.c.bf16 %v752_v0, %v751_v63  ;;  %v1500_v3 = vpop.f32.mrb[12].mxu1  ;;  %1541 = vmatpush3.bf16.msra.mxu0 %v1665_v22 }
 0x207   : > { %v728_v5 = vpop.f32.mrb[13].mxu1  ;;  %1542 = vmatprep.subr.bf16.mxu0 %v2016_v23  ;;  %v2106_v8 = vadd.f32 %v1500_v3, %v2027_v25 }
 0x208   : > { %v2103_v6 = vadd.f32 %v2027_v25, %v728_v5  ;;  %v1501_v7 = vpop.f32.mrb[14].mxu1  ;;  %1526 = vmatprep.mubr.bf16.mxu0 %v763_v2 }
 0x209   : > { %v2109_v9 = vadd.f32 %v1501_v7, %v2027_v25  ;;  %v731_v10 = vpop.f32.mrb[15].mxu1  ;;  %1527 = vmatmul.mubr.bf16.gmra.mrb[24].mxu0 %v764_v4  ;;  %v757_v15 = vmax.f32 %v2106_v8, 0.0 }
 0x20a   : > { %v2112_v11 = vadd.f32 %v2027_v25, %v731_v10  ;;  %1543 = vmatpush3.bf16.msra.mxu0 %v2016_v23  ;;  %v755_v13 = vmax.f32 %v2103_v6, 0.0 }
 0x20b   : > { %v758_v12 = vmax.f32 %v2109_v9, 0.0  ;;  %1544 = vmatprep.subr.bf16.mxu0 %v2019_v24 }
 0x20c   : > { %v756_v14 = vmax.f32 %v2112_v11, 0.0 }
 0x20d   : > { %v766_v17 = vpack.c.bf16 %v758_v12, %v757_v15 }
 0x20e   : > { %v765_v16 = vpack.c.bf16 %v756_v14, %v755_v13  ;;  %1545 = vmatpush3.bf16.msra.mxu0 %v2019_v24 }
 0x20f   : > { %1546 = vmatprep.subr.bf16.mxu0 %v1668_v18 }
 0x210   : > { %1530 = vmatprep.mubr.bf16.mxu0 %v765_v16 }
 0x211   : > { %1531 = vmatmul.mubr.bf16.gmra.mrb[28].mxu0 %v766_v17 }
 0x212   : > { %1547 = vmatpush3.bf16.msra.mxu0 %v1668_v18 }
 0x213   : > { %1548 = vmatprep.subr.bf16.mxu0 %v1669_v19 }
 0x216   : > { %1549 = vmatpush3.bf16.msra.mxu0 %v1669_v19 }
 0x2cc   : > { %v1520_v21 = vpop.f32.mrb[16].mxu0 }
 0x2cd   : > { %v881_v22 = vadd.f32 %v1520_v21, %v1368_v20  ;;  %v872_v23 = vpop.f32.mrb[17].mxu0 }
 0x2ce   : > { %v873_v24 = vadd.f32 %v1368_v20, %v872_v23  ;;  %v1521_v25 = vpop.f32.mrb[18].mxu0 }
 0x2cf   : > { %v884_v26 = vadd.f32 %v1521_v25, %v1368_v20  ;;  %v875_v27 = vpop.f32.mrb[19].mxu0  ;;  %v937_v32 = vmax.f32 %v881_v22, 0.0 }
 0x2d0   : > { %v876_v29 = vadd.f32 %v1368_v20, %v875_v27  ;;  %v935_v39 = vmax.f32 %v873_v24, 0.0 }
 0x2d1   : > { %v938_v38 = vmax.f32 %v884_v26, 0.0 }
 0x2d2   : > { %v936_v40 = vmax.f32 %v876_v29, 0.0 }
 0x2d3   : > { %v952_v41 = vpack.c.bf16 %v938_v38, %v937_v32 }
 0x2d4   : > { %v951_v43 = vpack.c.bf16 %v936_v40, %v935_v39  ;;  %v1524_v46 = vpop.f32.mrb[20].mxu0 }
 0x2d5   : > { %v897_v52 = vadd.f32 %v1524_v46, %v1368_v20  ;;  %v888_v53 = vpop.f32.mrb[21].mxu0 }
 0x2d6   : > { %v889_v54 = vadd.f32 %v1368_v20, %v888_v53  ;;  %v1525_v55 = vpop.f32.mrb[22].mxu0  ;;  %1550 = vmatprep.mubr.bf16.mxu0 %v951_v43 }
 0x2d7   : > { %v900_v57 = vadd.f32 %v1525_v55, %v1368_v20  ;;  %v891_v60 = vpop.f32.mrb[23].mxu0  ;;  %1551 = vmatmul.mubr.bf16.vlgmr.msra.gmra.mrb[32].mxu0 %v952_v41  ;;  %v941_v3 = vmax.f32 %v897_v52, 0.0 }
 0x2d8   : > { %v892_v2 = vadd.f32 %v1368_v20, %v891_v60  ;;  %v939_v5 = vmax.f32 %v889_v54, 0.0 }
 0x2d9   : > { %v942_v4 = vmax.f32 %v900_v57, 0.0 }
 0x2da   : > { %v940_v7 = vmax.f32 %v892_v2, 0.0 }
 0x2db   : > { %v954_v10 = vpack.c.bf16 %v942_v4, %v941_v3 }
 0x2dc   : > { %v953_v16 = vpack.c.bf16 %v940_v7, %v939_v5  ;;  %v1528_v17 = vpop.f32.mrb[24].mxu0  ;;  %v2135_v7 = vld [vmem:[%s2301_s8] ss:$0 sm:$0xff] }
 0x2dd   : > { %v913_v18 = vadd.f32 %v1528_v17, %v1368_v20  ;;  %v904_v19 = vpop.f32.mrb[25].mxu0 }
 0x2de   : > { %v905_v21 = vadd.f32 %v1368_v20, %v904_v19  ;;  %v1529_v22 = vpop.f32.mrb[26].mxu0  ;;  %1554 = vmatprep.mubr.bf16.mxu1 %v953_v16 }
 0x2df   : > { %v916_v23 = vadd.f32 %v1529_v22, %v1368_v20  ;;  %v907_v24 = vpop.f32.mrb[27].mxu0  ;;  %1555 = vmatmul.mubr.bf16.vlgmr.msra.gmra.mrb[16].mxu1 %v954_v10  ;;  %v945_v26 = vmax.f32 %v913_v18, 0.0 }
 0x2e0   : > { %v908_v25 = vadd.f32 %v1368_v20, %v907_v24  ;;  %v943_v29 = vmax.f32 %v905_v21, 0.0 }
 0x2e1   : > { %v946_v27 = vmax.f32 %v916_v23, 0.0 }
 0x2e2   : > { %v944_v32 = vmax.f32 %v908_v25, 0.0 }
 0x2e3   : > { %v956_v38 = vpack.c.bf16 %v946_v27, %v945_v26  ;;  %v1127_v26 = vlaneseq }
 0x2e4   : > { %v955_v39 = vpack.c.bf16 %v944_v32, %v943_v29  ;;  %v1532_v40 = vpop.f32.mrb[28].mxu0 }
 0x2e5   : > { %v929_v41 = vadd.f32 %v1532_v40, %v1368_v20  ;;  %v920_v43 = vpop.f32.mrb[29].mxu0 }
 0x2e6   : > { %v921_v46 = vadd.f32 %v1368_v20, %v920_v43  ;;  %v1533_v52 = vpop.f32.mrb[30].mxu0  ;;  %1558 = vmatprep.mubr.bf16.mxu1 %v955_v39  ;;  %v2146_v43 = vand.u32 127, %v1127_v26 }
 0x2e7   : > { %v932_v53 = vadd.f32 %v1533_v52, %v1368_v20  ;;  %v923_v54 = vpop.f32.mrb[31].mxu0  ;;  %1559 = vmatmul.mubr.bf16.gmra.mrb[20].mxu1 %v956_v38  ;;  %v949_v57 = vmax.f32 %v929_v41, 0.0 }
 0x2e8   : > { %v924_v55 = vadd.f32 %v1368_v20, %v923_v54  ;;  %v947_v2 = vmax.f32 %v921_v46, 0.0  ;;  %vm1210_vm1 = vcmp.lt.s32.totalorder %v2146_v43, 32 }
 0x2e9   : > { %v950_v60 = vmax.f32 %v932_v53, 0.0 }
 0x2ea   : > { %v948_v3 = vmax.f32 %v924_v55, 0.0 }
 0x2eb   : > { %v958_v4 = vpack.c.bf16 %v950_v60, %v949_v57 }
 0x2ec   : > { %v957_v5 = vpack.c.bf16 %v948_v3, %v947_v2 }
 0x2ee   : > { %1562 = vmatprep.mubr.bf16.mxu1 %v957_v5 }
 0x2ef   : > { %1563 = vmatmul.mubr.bf16.gmra.mrb[24].mxu1 %v958_v4 }
 0x3aa   : > { %v1552_v10 = vpop.f32.mrb[32].mxu0 }
 0x3ab   : > { %v1073_v16 = vadd.f32 %v1552_v10, %v2135_v7  ;;  %v1064_v17 = vpop.f32.mrb[33].mxu0 }
 0x3ac   : > { %v1065_v18 = vadd.f32 %v2135_v7, %v1064_v17  ;;  %v1553_v20 = vpop.f32.mrb[34].mxu0 }
 0x3ad   : > { %1670 = vtanh.f32 %v1073_v16  ;;  %v1076_v19 = vadd.f32 %v1553_v20, %v2135_v7  ;;  %v1067_v21 = vpop.f32.mrb[35].mxu0 }
 0x3ae   : > { %1672 = vtanh.f32 %v1065_v18  ;;  %v1068_v22 = vadd.f32 %v2135_v7, %v1067_v21 }
 0x3af   : > { %1674 = vtanh.f32 %v1076_v19 }
 0x3b0   : > { %1676 = vtanh.f32 %v1068_v22 }
 0x3b2   : > { %v1556_v23 = vpop.f32.mrb[16].mxu1 }
 0x3b3   : > { %v1089_v24 = vadd.f32 %v1556_v23, %v2135_v7  ;;  %v1080_v25 = vpop.f32.mrb[17].mxu1 }
 0x3b4   : > { %v1081_v27 = vadd.f32 %v2135_v7, %v1080_v25  ;;  %v1557_v29 = vpop.f32.mrb[18].mxu1 }
 0x3b5   : > { %1678 = vtanh.f32 %v1089_v24  ;;  %v1092_v32 = vadd.f32 %v1557_v29, %v2135_v7  ;;  %v1083_v38 = vpop.f32.mrb[19].mxu1 }
 0x3b6   : > { %1680 = vtanh.f32 %v1081_v27  ;;  %v1084_v39 = vadd.f32 %v2135_v7, %v1083_v38 }
 0x3b7   : > { %v1671_v40 = vpop.eup %1670  ;;  %1682 = vtanh.f32 %v1092_v32 }
 0x3b8   : > { %v1673_v41 = vpop.eup %1672  ;;  %v1147_v46 = vadd.f32 1.0, %v1671_v40  ;;  %1684 = vtanh.f32 %v1084_v39 }
 0x3b9   : > { %v1675_v52 = vpop.eup %1674  ;;  %v1145_v53 = vadd.f32 1.0, %v1673_v41 }
 0x3ba   : > { %v1677_v54 = vpop.eup %1676  ;;  %v1164_v55 = vmul.f32 0.5, %v1147_v46  ;;  %v1148_v57 = vadd.f32 1.0, %v1675_v52  ;;  %v1560_v60 = vpop.f32.mrb[20].mxu1 }
 0x3bb   : > { %v1162_v2 = vmul.f32 0.5, %v1145_v53  ;;  %v1146_v3 = vadd.f32 1.0, %v1677_v54  ;;  %v1105_v4 = vadd.f32 %v1560_v60, %v2135_v7  ;;  %v1096_v5 = vpop.f32.mrb[21].mxu1 }
 0x3bc   : > { %v1180_v10 = vmul.f32 2.0, %v1164_v55  ;;  %v1165_v16 = vmul.f32 0.5, %v1148_v57  ;;  %v1097_v17 = vadd.f32 %v2135_v7, %v1096_v5  ;;  %v1561_v18 = vpop.f32.mrb[22].mxu1 }
 0x3bd   : > { %v1178_v20 = vmul.f32 2.0, %v1162_v2  ;;  %v1163_v19 = vmul.f32 0.5, %v1146_v3  ;;  %1686 = vtanh.f32 %v1105_v4  ;;  %v1108_v21 = vadd.f32 %v1561_v18, %v2135_v7  ;;  %v1099_v22 = vpop.f32.mrb[23].mxu1 }
 0x3be   : > { %v1196_v23 = vadd.f32 -1.0, %v1180_v10  ;;  %v1181_v24 = vmul.f32 2.0, %v1165_v16  ;;  %1688 = vtanh.f32 %v1097_v17  ;;  %v1100_v25 = vadd.f32 %v2135_v7, %v1099_v22 }
 0x3bf   : > { %v1679_v26 = vpop.eup %1678  ;;  %v1194_v27 = vadd.f32 -1.0, %v1178_v20  ;;  %v1179_v29 = vmul.f32 2.0, %v1163_v19  ;;  %1690 = vtanh.f32 %v1108_v21 }
 0x3c0   : > { %v1681_v32 = vpop.eup %1680  ;;  %v1213_v38 = vsel %vm1210_vm1, %v745_v37, %v1196_v23  ;;  %v1197_v39 = vadd.f32 -1.0, %v1181_v24  ;;  %v1151_v40 = vadd.f32 1.0, %v1679_v26  ;;  %1692 = vtanh.f32 %v1100_v25 }
 0x3c1   : > { %v1683_v41 = vpop.eup %1682  ;;  %1229 = vst [vmem:[%s2159_s16 + $0x10] sm:$0xff] %v1213_v38  ;;  %v1211_v46 = vsel %vm1210_vm1, %v743_v35, %v1194_v27  ;;  %v1195_v30 = vadd.f32 -1.0, %v1179_v29  ;;  %v1149_v52 = vadd.f32 1.0, %v1681_v32 }
 0x3c2   : > { %v1685_v53 = vpop.eup %1684  ;;  %1227 = vst [vmem:[%s2159_s16] sm:$0xff] %v1211_v46  ;;  %v1214_v37 = vsel %vm1210_vm1, %v746_v34, %v1197_v39  ;;  %v1168_v54 = vmul.f32 0.5, %v1151_v40  ;;  %v1152_v55 = vadd.f32 1.0, %v1683_v41  ;;  %v1564_v57 = vpop.f32.mrb[24].mxu1 }
 0x3c3   : > { %1230 = vst [vmem:[%s2159_s16 + $0x18] sm:$0xff] %v1214_v37  ;;  %v1212_v28 = vsel %vm1210_vm1, %v744_v36, %v1195_v30  ;;  %v1166_v60 = vmul.f32 0.5, %v1149_v52  ;;  %v1150_v35 = vadd.f32 1.0, %v1685_v53  ;;  %v1121_v2 = vadd.f32 %v1564_v57, %v2135_v7  ;;  %v1112_v3 = vpop.f32.mrb[25].mxu1 }
 0x3c4   : > { %1228 = vst [vmem:[%s2159_s16 + $0x8] sm:$0xff] %v1212_v28  ;;  %v1184_v4 = vmul.f32 2.0, %v1168_v54  ;;  %v1169_v31 = vmul.f32 0.5, %v1152_v55  ;;  %v1113_v5 = vadd.f32 %v2135_v7, %v1112_v3  ;;  %v1565_v34 = vpop.f32.mrb[26].mxu1 }
 0x3c5   : > { %v1182_v10 = vmul.f32 2.0, %v1166_v60  ;;  %v1167_v16 = vmul.f32 0.5, %v1150_v35  ;;  %1694 = vtanh.f32 %v1121_v2  ;;  %v1124_v17 = vadd.f32 %v1565_v34, %v2135_v7  ;;  %v1115_v33 = vpop.f32.mrb[27].mxu1 }
 0x3c6   : > { %v1200_v18 = vadd.f32 -1.0, %v1184_v4  ;;  %v1185_v36 = vmul.f32 2.0, %v1169_v31  ;;  %1696 = vtanh.f32 %v1113_v5  ;;  %v1116_v20 = vadd.f32 %v2135_v7, %v1115_v33 }
 0x3c7   : > { %v1687_v19 = vpop.eup %1686  ;;  %v1198_v21 = vadd.f32 -1.0, %v1182_v10  ;;  %v1183_v22 = vmul.f32 2.0, %v1167_v16  ;;  %1698 = vtanh.f32 %v1124_v17 }
 0x3c8   : > { %v1689_v23 = vpop.eup %1688  ;;  %v1217_v24 = vsel %vm1210_vm1, %v749_v51, %v1200_v18  ;;  %v1201_v25 = vadd.f32 -1.0, %v1185_v36  ;;  %v1155_v26 = vadd.f32 1.0, %v1687_v19  ;;  %1700 = vtanh.f32 %v1116_v20 }
 0x3c9   : > { %v1691_v27 = vpop.eup %1690  ;;  %1233 = vst [vmem:[%s2159_s16 + $0x30] sm:$0xff] %v1217_v24  ;;  %v1215_v7 = vsel %vm1210_vm1, %v747_v49, %v1198_v21  ;;  %v1199_v29 = vadd.f32 -1.0, %v1183_v22  ;;  %v1153_v32 = vadd.f32 1.0, %v1689_v23 }
 0x3ca   : > { %v1693_v38 = vpop.eup %1692  ;;  %1231 = vst [vmem:[%s2159_s16 + $0x20] sm:$0xff] %v1215_v7  ;;  %v1218_v44 = vsel %vm1210_vm1, %v750_v48, %v1201_v25  ;;  %v1172_v51 = vmul.f32 0.5, %v1155_v26  ;;  %v1156_v39 = vadd.f32 1.0, %v1691_v27 }
 0x3cb   : > { %1234 = vst [vmem:[%s2159_s16 + $0x38] sm:$0xff] %v1218_v44  ;;  %v1216_v42 = vsel %vm1210_vm1, %v748_v50, %v1199_v29  ;;  %v1170_v40 = vmul.f32 0.5, %v1153_v32  ;;  %v1154_v41 = vadd.f32 1.0, %v1693_v38 }
 0x3cc   : > { %1232 = vst [vmem:[%s2159_s16 + $0x28] sm:$0xff] %v1216_v42  ;;  %v1188_v49 = vmul.f32 2.0, %v1172_v51  ;;  %v1173_v46 = vmul.f32 0.5, %v1156_v39 }
 0x3cd   : > { %v1186_v30 = vmul.f32 2.0, %v1170_v40  ;;  %v1171_v52 = vmul.f32 0.5, %v1154_v41 }
 0x3ce   : > { %v1204_v45 = vadd.f32 -1.0, %v1188_v49  ;;  %v1189_v53 = vmul.f32 2.0, %v1173_v46 }
 0x3cf   : > { %v1695_v48 = vpop.eup %1694  ;;  %v1202_v37 = vadd.f32 -1.0, %v1186_v30  ;;  %v1187_v54 = vmul.f32 2.0, %v1171_v52 }
 0x3d0   : > { %v1697_v55 = vpop.eup %1696  ;;  %v1221_v47 = vsel %vm1210_vm1, %v753_v1, %v1204_v45  ;;  %v1205_v50 = vadd.f32 -1.0, %v1189_v53  ;;  %v1159_v57 = vadd.f32 1.0, %v1695_v48 }
 0x3d1   : > { %v1699_v28 = vpop.eup %1698  ;;  %1237 = vst [vmem:[%s2159_s16 + $0x50] sm:$0xff] %v1221_v47  ;;  %v1219_v60 = vsel %vm1210_vm1, %v751_v63, %v1202_v37  ;;  %v1203_v35 = vadd.f32 -1.0, %v1187_v54  ;;  %v1157_v2 = vadd.f32 1.0, %v1697_v55 }
 0x3d2   : > { %v1701_v3 = vpop.eup %1700  ;;  %1235 = vst [vmem:[%s2159_s16 + $0x40] sm:$0xff] %v1219_v60  ;;  %v1222_v58 = vsel %vm1210_vm1, %v754_v62, %v1205_v50  ;;  %v1176_v1 = vmul.f32 0.5, %v1159_v57  ;;  %v1160_v4 = vadd.f32 1.0, %v1699_v28 }
 0x3d3   : > { %1238 = vst [vmem:[%s2159_s16 + $0x58] sm:$0xff] %v1222_v58  ;;  %v1220_v56 = vsel %vm1210_vm1, %v752_v0, %v1203_v35  ;;  %v1174_v63 = vmul.f32 0.5, %v1157_v2  ;;  %v1158_v31 = vadd.f32 1.0, %v1701_v3 }
 0x3d4   : > { %1236 = vst [vmem:[%s2159_s16 + $0x48] sm:$0xff] %v1220_v56  ;;  %v1192_v5 = vmul.f32 2.0, %v1176_v1  ;;  %v1177_v34 = vmul.f32 0.5, %v1160_v4 }
 0x3d5   : > { %v1190_v59 = vmul.f32 2.0, %v1174_v63  ;;  %v1175_v10 = vmul.f32 0.5, %v1158_v31 }
 0x3d6   : > { %v1208_v16 = vadd.f32 -1.0, %v1192_v5  ;;  %v1193_v62 = vmul.f32 2.0, %v1177_v34 }
 0x3d7   : > { %v1206_v61 = vadd.f32 -1.0, %v1190_v59  ;;  %v1191_v17 = vmul.f32 2.0, %v1175_v10 }
 0x3d8   : > { %v1225_v0 = vsel %vm1210_vm1, %v757_v15, %v1208_v16  ;;  %v1209_v33 = vadd.f32 -1.0, %v1193_v62 }
 0x3d9   : > { %1241 = vst [vmem:[%s2159_s16 + $0x70] sm:$0xff] %v1225_v0  ;;  %v1223_v18 = vsel %vm1210_vm1, %v755_v13, %v1206_v61  ;;  %v1207_v36 = vadd.f32 -1.0, %v1191_v17 }
 0x3da   : > { %1239 = vst [vmem:[%s2159_s16 + $0x60] sm:$0xff] %v1223_v18  ;;  %v1226_v6 = vsel %vm1210_vm1, %v758_v12, %v1209_v33 }
 0x3db   : > { %1242 = vst [vmem:[%s2159_s16 + $0x78] sm:$0xff] %v1226_v6  ;;  %v1224_v8 = vsel %vm1210_vm1, %v756_v14, %v1207_v36 }
 0x3dc   : > { %1240 = vst [vmem:[%s2159_s16 + $0x68] sm:$0xff] %v1224_v8 }
 0x3dd   : > { %1743 = shalt.err (!%p1740_p7)
}
 0x3de   : > { %s1744_s14 = scalar_lea.hbm %s2235_s22, 2048  ;;  %s1748_s23 = scalar_lea.hbm %s2302_s9, 4096 }
 0x3df   : > { %p1745_p8 = scmp.ne.s32.totalorder %s2235_s22, %s1744_s14  ;;  %p1749_p1 = scmp.lt.u32.totalorder %s2235_s22, %s2302_s9 }
 0x3e0   : > { %p1750_p0 = scmp.lt.u32.totalorder %s1748_s23, %s1744_s14  ;;  %p1752_p6 = scmp.lt.u32.totalorder %s1744_s14, %s2235_s22 }
 0x3e1   : > { %p1746_p11 = pnand %p1745_p8, %p2313_p9 }
 0x3e2   : > { %p1751_p5 = por %p1750_p0, %p1749_p1 }
 0x3e3   : > { %p1747_p13 = pneg %p1746_p11 }
 0x3e4   : > { %p1753_p10 = por %p1752_p6, %p1751_p5 }
 0x3e6   : > { %p1754_p12 = pnand %p1753_p10, %p1747_p13 }
 0x3e8   : > { %1757 = shalt.err (!%p1754_p12)
}
 0x3e9   : > { %s1802_s26 = smov 128   ;;  %s1803_s28 = smov 8  }
 0x3ea   : > { %1586 = dma.vmem_to_hbm [thread:$0]  (%p2313_p9), %s2237_s17, 2048, %s2235_s22, %s2252_s25, %s1802_s26, %s1802_s26, %s1803_s28  }
 0x3eb PF: > { %p1598_p2 = scmp.ge.s32.totalorder %s1796_s12, 2  ;;  %s1272_s27 = sand.u32 1, %s1784_s30  }
 0x3ec   : > { %p2314_p3 = scmp.ne.s32.totalorder %s2307_s20, 0  ;;  %s1273_s29 = scalar_lea.sflag [#allocation4], %s1272_s27 }
 0x3ee   : > { %p1593_p4 = pnand %p1598_p2, %p2314_p3 }
 0x3f0   : > { %1779 = dma.done.wait (!%p1593_p4), %s1273_s29, 2048  }
 0x3f1   : > { %1781 = vsyncadd (!%p1593_p4), %s1273_s29, 4294965248  ;;  %p20_p7 = scmp.ge.s32.totalorder %s1879_s15, 4   ;;  %s2315_s30 = smov %s1788_s10 }
 0x3f2   : > { %s2316_s10 = smov %s1792_s11  ;;  %s2317_s11 = smov %s1890_s18 }
 0x3f3   : > { %s2318_s12 = smov %s1879_s15  ;;  %22 = sbr.rel (!%p20_p7) target bundleno = 4 (0x4), region = 96 }
 0x3fa   :  { %1278 = vsyncpa [#allocation3], 1 }
 0x3fb   :  { %1280 = vsyncpa [#allocation3 + $0x1], 1 }
 0x3fc   :  { %1281 = vsyncpa [#allocation4], 1 }
 0x3fd   :  { %1283 = vsyncpa [#allocation4 + $0x1], 1 }

</bundles_post_ra>
